<compile_context>
chip_gen: v5e
topology: v5e:2x2
jax: 0.10.0
libtpu: 0.0.40
codegen_flags: <defaults>
</compile_context>

<pallas_src>
import jax
import jax.numpy as jnp
from jax.experimental import pallas as pl
from jax.experimental.pallas import tpu as pltpu


def _pick_spatial_tile(n, cap=2048):
    """Spatial (lane) tile: full dim if small, else the largest 128-multiple divisor."""
    if n <= cap:
        return n
    for t in range(cap - cap % 128, 0, -128):
        if n % t == 0:
            return t
    return n  # full dim is always a legal block shape


# ----------------------------------------------------------------------------
# Fused Pallas kernel: ReLU + two half-K 1x1-conv matmuls + eval-mode BN
# ----------------------------------------------------------------------------

def _fr_kernel(a1_ref, a2_ref, w1_ref, w2_ref, scale_ref, shift_ref, o_ref):
    # ReLU fused into the matmul pass (VPU work hidden under MXU cycles; on v5e the
    # bf16 max round-trips through f32 but remains hidden under the heavier MXU time).
    a1 = jnp.maximum(a1_ref[...], 0)            # (C_in, tn) bf16
    a2 = jnp.maximum(a2_ref[...], 0)
    # Two half-K MXU dots (no zero block-diagonal half), f32 accumulation.
    y1 = jnp.dot(w1_ref[...], a1, preferred_element_type=jnp.float32)   # (C_half, tn)
    y2 = jnp.dot(w2_ref[...], a2, preferred_element_type=jnp.float32)   # (C_half, tn)
    # Eval-mode BN: f32 per-channel scale applied to the f32 accumulator + f32 shift.
    # Each half goes to its own channel slab -> output is already in NCHW cat order.
    o_ref[0, :, :] = (y1 * scale_ref[0] + shift_ref[0]).astype(o_ref.dtype)
    o_ref[1, :, :] = (y2 * scale_ref[1] + shift_ref[1]).astype(o_ref.dtype)


def _fr_fused_call(a1, a2, w1, w2, scale, shift, *, tn, out_dtype):
    B, C_in, M = a1.shape
    C_half = w1.shape[0]
    grid = (B, M // tn)
    return pl.pallas_call(
        _fr_kernel,
        out_shape=jax.ShapeDtypeStruct((B, 2, C_half, M), out_dtype),
        grid=grid,
        in_specs=[
            pl.BlockSpec((None, C_in, tn), lambda b, j: (b, 0, j)),   # even/even grid
            pl.BlockSpec((None, C_in, tn), lambda b, j: (b, 0, j)),   # odd/odd grid
            # Constant index_map -> resident in VMEM across all grid steps (no re-DMA).
            pl.BlockSpec((C_half, C_in), lambda b, j: (0, 0)),        # conv_1 weight
            pl.BlockSpec((C_half, C_in), lambda b, j: (0, 0)),        # conv_2 weight
            pl.BlockSpec((2, C_half, 1), lambda b, j: (0, 0, 0)),     # BN scale (f32)
            pl.BlockSpec((2, C_half, 1), lambda b, j: (0, 0, 0)),     # BN shift (f32)
        ],
        out_specs=pl.BlockSpec((None, 2, C_half, tn), lambda b, j: (b, 0, 0, j)),
        compiler_params=pltpu.CompilerParams(
            dimension_semantics=("parallel", "parallel"),   # megacore-shardable on v7x
        ),
    )(a1, a2, w1, w2, scale, shift)


# ----------------------------------------------------------------------------
# Parameter preparation (done ONCE, not per call)
# ----------------------------------------------------------------------------

def prepare_factorized_reduce(w1, w2, bn, eps=1e-5):
    """w1, w2: (C_out//2, C_in, 1, 1) PyTorch OIHW; bn: eval-mode stats/affine."""
    C_half, C_in = w1.shape[0], w1.shape[1]
    w1m = w1[:, :, 0, 0].astype(jnp.bfloat16)            # (C_half, C_in) MXU LHS
    w2m = w2[:, :, 0, 0].astype(jnp.bfloat16)
    # Fold eval-mode BN shift only; keep the per-channel scale in f32 and apply it to
    # the f32 accumulator inside the kernel (avoids bf16 precision loss in the weights).
    scale = bn["gamma"] / jnp.sqrt(bn["var"] + eps)      # (C_out,)
    shift = bn["beta"] - bn["mean"] * scale
    scale2 = scale.astype(jnp.float32).reshape(2, C_half, 1)
    shift2 = shift.astype(jnp.float32).reshape(2, C_half, 1)
    return {"w1": w1m, "w2": w2m, "scale": scale2, "shift": shift2,
            "C_half": C_half, "C_in": C_in}


# ----------------------------------------------------------------------------
# Forward pass (eval mode), matching FactorizedReduce.forward semantics
# ----------------------------------------------------------------------------

def factorized_reduce_forward(prep, x_nchw, out_dtype=jnp.float32):
    """x_nchw: (B, C_in, H, W) float32 -> (B, C_out, H//2, W//2) in `out_dtype`.

    Pass out_dtype=jnp.bfloat16 to halve output writeback when the consumer is bf16.
    """
    B, C_in, H, W = x_nchw.shape
    Ho1, Wo1 = (H - 1) // 2 + 1, (W - 1) // 2 + 1        # conv_1 output grid
    Ho2, Wo2 = (H - 2) // 2 + 1, (W - 2) // 2 + 1        # conv_2 output grid
    # Odd H/W would make the two conv outputs mismatch (torch.cat in the reference
    # also fails); only even spatial dims are supported.
    assert (Ho1, Wo1) == (Ho2, Wo2), "FactorizedReduce requires even spatial dims"
    Ho, Wo = Ho1, Wo1
    C_half = prep["C_half"]

    # Minimal glue: two strided gathers + bf16 cast (each fuses into a single XLA copy).
    # No NCHW<->NHWC transposes anywhere — channels stay on the sublane axis and the
    # flattened Ho*Wo spatial axis is the lane axis, so the kernel emits the final NCHW
    # channel-concat layout directly.
    # TODO(synk): the stride-2 gather could move in-kernel (memory_space=pl.ANY + strided
    # make_async_copy) so the activation crosses HBM exactly once each way.
    a1 = x_nchw[:, :, 0::2, 0::2].reshape(B, C_in, Ho * Wo).astype(jnp.bfloat16)
    a2 = x_nchw[:, :, 1::2, 1::2].reshape(B, C_in, Ho * Wo).astype(jnp.bfloat16)

    M = Ho * Wo
    tn = _pick_spatial_tile(M)

    out = _fr_fused_call(a1, a2, prep["w1"], prep["w2"], prep["scale"], prep["shift"],
                         tn=tn, out_dtype=out_dtype)      # (B, 2, C_half, Ho*Wo)
    # Free reshape (adjacent-dim merge/split): (B, 2, C_half, Ho*Wo) -> (B, C_out, Ho, Wo)
    return out.reshape(B, 2 * C_half, Ho, Wo)


# ----------------------------------------------------------------------------
# Pure-JAX reference (f32) for correctness checking
# ----------------------------------------------------------------------------

def factorized_reduce_reference(x_nchw, w1, w2, bn, eps=1e-5):
    x = jax.nn.relu(x_nchw)
    y1 = jnp.einsum("bchw,oc->bohw", x[:, :, 0::2, 0::2], w1[:, :, 0, 0])
    y2 = jnp.einsum("bchw,oc->bohw", x[:, :, 1::2, 1::2], w2[:, :, 0, 0])
    y = jnp.concatenate([y1, y2], axis=1)
    scale = bn["gamma"] / jnp.sqrt(bn["var"] + eps)
    shift = bn["beta"] - bn["mean"] * scale
    return y * scale[None, :, None, None] + shift[None, :, None, None]


# ----------------------------------------------------------------------------

if __name__ == "__main__":
    key = jax.random.PRNGKey(0)
    k_x, k_w1, k_w2, k_g, k_b, k_m, k_v = jax.random.split(key, 7)

    B, C_in, H, W = 2, 4, 16, 16
    C_out = 8  # must be even

    x = jax.random.normal(k_x, (B, C_in, H, W), jnp.float32)
    w1 = 0.1 * jax.random.normal(k_w1, (C_out // 2, C_in, 1, 1), jnp.float32)
    w2 = 0.1 * jax.random.normal(k_w2, (C_out // 2, C_in, 1, 1), jnp.float32)
    bn = {
        "gamma": 1.0 + 0.1 * jax.random.normal(k_g, (C_out,), jnp.float32),
        "beta": 0.1 * jax.random.normal(k_b, (C_out,), jnp.float32),
        "mean": 0.1 * jax.random.normal(k_m, (C_out,), jnp.float32),
        "var": 1.0 + 0.1 * jax.random.uniform(k_v, (C_out,), jnp.float32),
    }

    prep = prepare_factorized_reduce(w1, w2, bn)   # one-time weight cast + BN fold

    fwd = jax.jit(lambda inp: factorized_reduce_forward(prep, inp))
    y = fwd(x)
    jax.block_until_ready(y)

    assert y.shape == (B, C_out, H // 2, W // 2), y.shape
    assert y.dtype == jnp.float32

    y_ref = factorized_reduce_reference(x, w1, w2, bn)
    max_err = float(jnp.max(jnp.abs(y - y_ref)))
    assert max_err < 5e-2, f"max abs error {max_err}"   # bf16-operand tolerance

    print("KERNEL_OK")
</pallas_src>

<mosaic_0001>
module attributes {stable_mosaic.version = 11 : i64} {
  func.func @_fr_kernel(%arg0: i32, %arg1: i32, %arg2: memref<1x4x64xbf16, #tpu.memory_space<vmem>>, %arg3: memref<1x4x64xbf16, #tpu.memory_space<vmem>>, %arg4: memref<4x4xbf16, #tpu.memory_space<vmem>>, %arg5: memref<4x4xbf16, #tpu.memory_space<vmem>>, %arg6: memref<2x4x1xf32, #tpu.memory_space<vmem>>, %arg7: memref<2x4x1xf32, #tpu.memory_space<vmem>>, %arg8: memref<1x2x4x64xf32, #tpu.memory_space<vmem>>) attributes {dimension_semantics = [#tpu.dimension_semantics<parallel>, #tpu.dimension_semantics<parallel>], iteration_bounds = array<i64: 2, 1>, scalar_prefetch = 0 : i64, scratch_operands = 0 : i64, tpu.core_type = #tpu.core_type<tc>, window_params = [{transform_indices = @transform_0, window_bounds = array<i64: 1, 4, 64>}, {transform_indices = @transform_1, window_bounds = array<i64: 1, 4, 64>}, {pipeline_mode = #tpu.pipeline_mode<synchronous>, transform_indices = @transform_2, window_bounds = array<i64: 4, 4>}, {pipeline_mode = #tpu.pipeline_mode<synchronous>, transform_indices = @transform_3, window_bounds = array<i64: 4, 4>}, {pipeline_mode = #tpu.pipeline_mode<synchronous>, transform_indices = @transform_4, window_bounds = array<i64: 2, 4, 1>}, {pipeline_mode = #tpu.pipeline_mode<synchronous>, transform_indices = @transform_5, window_bounds = array<i64: 2, 4, 1>}, {transform_indices = @transform_6, window_bounds = array<i64: 1, 2, 4, 64>}]} {
    %c0 = arith.constant 0 : index
    %c0_0 = arith.constant 0 : index
    %c0_1 = arith.constant 0 : index
    %0 = vector.load %arg2[%c0, %c0_0, %c0_1] : memref<1x4x64xbf16, #tpu.memory_space<vmem>>, vector<1x4x64xbf16>
    %1 = vector.shape_cast %0 : vector<1x4x64xbf16> to vector<4x64xbf16>
    %cst = arith.constant 0.000000e+00 : bf16
    %2 = vector.broadcast %cst : bf16 to vector<4x64xbf16>
    %3 = arith.maximumf %1, %2 : vector<4x64xbf16>
    %c0_2 = arith.constant 0 : index
    %c0_3 = arith.constant 0 : index
    %c0_4 = arith.constant 0 : index
    %4 = vector.load %arg3[%c0_2, %c0_3, %c0_4] : memref<1x4x64xbf16, #tpu.memory_space<vmem>>, vector<1x4x64xbf16>
    %5 = vector.shape_cast %4 : vector<1x4x64xbf16> to vector<4x64xbf16>
    %cst_5 = arith.constant 0.000000e+00 : bf16
    %6 = vector.broadcast %cst_5 : bf16 to vector<4x64xbf16>
    %7 = arith.maximumf %5, %6 : vector<4x64xbf16>
    %c0_6 = arith.constant 0 : index
    %c0_7 = arith.constant 0 : index
    %8 = vector.load %arg4[%c0_6, %c0_7] : memref<4x4xbf16, #tpu.memory_space<vmem>>, vector<4x4xbf16>
    %cst_8 = arith.constant dense<0.000000e+00> : vector<4x64xf32>
    %9 = tpu.matmul %8, %3, %cst_8 {dimension_numbers = #tpu.dot_dimension_numbers<[1], [0], [0], [1], [0, 0, 1, 1], [], []>} : vector<4x4xbf16>, vector<4x64xbf16>, vector<4x64xf32> -> vector<4x64xf32>
    %c0_9 = arith.constant 0 : index
    %c0_10 = arith.constant 0 : index
    %10 = vector.load %arg5[%c0_9, %c0_10] : memref<4x4xbf16, #tpu.memory_space<vmem>>, vector<4x4xbf16>
    %cst_11 = arith.constant dense<0.000000e+00> : vector<4x64xf32>
    %11 = tpu.matmul %10, %7, %cst_11 {dimension_numbers = #tpu.dot_dimension_numbers<[1], [0], [0], [1], [0, 0, 1, 1], [], []>} : vector<4x4xbf16>, vector<4x64xbf16>, vector<4x64xf32> -> vector<4x64xf32>
    %c0_12 = arith.constant 0 : index
    %c0_13 = arith.constant 0 : index
    %c0_14 = arith.constant 0 : index
    %12 = vector.load %arg6[%c0_12, %c0_13, %c0_14] : memref<2x4x1xf32, #tpu.memory_space<vmem>>, vector<1x4x1xf32>
    %13 = vector.shape_cast %12 : vector<1x4x1xf32> to vector<4x1xf32>
    %14 = vector.broadcast %13 : vector<4x1xf32> to vector<4x64xf32>
    %15 = arith.mulf %9, %14 : vector<4x64xf32>
    %c0_15 = arith.constant 0 : index
    %c0_16 = arith.constant 0 : index
    %c0_17 = arith.constant 0 : index
    %16 = vector.load %arg7[%c0_15, %c0_16, %c0_17] : memref<2x4x1xf32, #tpu.memory_space<vmem>>, vector<1x4x1xf32>
    %17 = vector.shape_cast %16 : vector<1x4x1xf32> to vector<4x1xf32>
    %18 = vector.broadcast %17 : vector<4x1xf32> to vector<4x64xf32>
    %19 = arith.addf %15, %18 : vector<4x64xf32>
    %c0_18 = arith.constant 0 : index
    %c0_19 = arith.constant 0 : index
    %c0_20 = arith.constant 0 : index
    %c0_21 = arith.constant 0 : index
    %20 = vector.load %arg8[%c0_18, %c0_19, %c0_20, %c0_21] : memref<1x2x4x64xf32, #tpu.memory_space<vmem>>, vector<1x1x4x64xf32>
    %21 = vector.shape_cast %20 : vector<1x1x4x64xf32> to vector<4x64xf32>
    %22 = vector.shape_cast %19 : vector<4x64xf32> to vector<1x1x4x64xf32>
    tpu.vector_store %arg8[%c0_18, %c0_19, %c0_20, %c0_21], %22 {strides = array<i32>} : memref<1x2x4x64xf32, #tpu.memory_space<vmem>>, vector<1x1x4x64xf32>,
    %c1 = arith.constant 1 : index
    %c0_22 = arith.constant 0 : index
    %c0_23 = arith.constant 0 : index
    %23 = vector.load %arg6[%c1, %c0_22, %c0_23] : memref<2x4x1xf32, #tpu.memory_space<vmem>>, vector<1x4x1xf32>
    %24 = vector.shape_cast %23 : vector<1x4x1xf32> to vector<4x1xf32>
    %25 = vector.broadcast %24 : vector<4x1xf32> to vector<4x64xf32>
    %26 = arith.mulf %11, %25 : vector<4x64xf32>
    %c1_24 = arith.constant 1 : index
    %c0_25 = arith.constant 0 : index
    %c0_26 = arith.constant 0 : index
    %27 = vector.load %arg7[%c1_24, %c0_25, %c0_26] : memref<2x4x1xf32, #tpu.memory_space<vmem>>, vector<1x4x1xf32>
    %28 = vector.shape_cast %27 : vector<1x4x1xf32> to vector<4x1xf32>
    %29 = vector.broadcast %28 : vector<4x1xf32> to vector<4x64xf32>
    %30 = arith.addf %26, %29 : vector<4x64xf32>
    %c0_27 = arith.constant 0 : index
    %c1_28 = arith.constant 1 : index
    %c0_29 = arith.constant 0 : index
    %c0_30 = arith.constant 0 : index
    %31 = vector.load %arg8[%c0_27, %c1_28, %c0_29, %c0_30] : memref<1x2x4x64xf32, #tpu.memory_space<vmem>>, vector<1x1x4x64xf32>
    %32 = vector.shape_cast %31 : vector<1x1x4x64xf32> to vector<4x64xf32>
    %33 = vector.shape_cast %30 : vector<4x64xf32> to vector<1x1x4x64xf32>
    tpu.vector_store %arg8[%c0_27, %c1_28, %c0_29, %c0_30], %33 {strides = array<i32>} : memref<1x2x4x64xf32, #tpu.memory_space<vmem>>, vector<1x1x4x64xf32>,
    return
  }
  func.func @transform_0(%arg0: i32, %arg1: i32) -> (i32, i32, i32) {
    %c0_i32 = arith.constant 0 : i32
    %c0_i32_0 = arith.constant 0 : i32
    return %arg0, %c0_i32, %arg1 : i32, i32, i32
  }
  func.func @transform_1(%arg0: i32, %arg1: i32) -> (i32, i32, i32) {
    %c0_i32 = arith.constant 0 : i32
    %c0_i32_0 = arith.constant 0 : i32
    return %arg0, %c0_i32, %arg1 : i32, i32, i32
  }
  func.func @transform_2(%arg0: i32, %arg1: i32) -> (i32, i32) {
    %c0_i32 = arith.constant 0 : i32
    %c0_i32_0 = arith.constant 0 : i32
    %c0_i32_1 = arith.constant 0 : i32
    return %c0_i32, %c0_i32_0 : i32, i32
  }
  func.func @transform_3(%arg0: i32, %arg1: i32) -> (i32, i32) {
    %c0_i32 = arith.constant 0 : i32
    %c0_i32_0 = arith.constant 0 : i32
    %c0_i32_1 = arith.constant 0 : i32
    return %c0_i32, %c0_i32_0 : i32, i32
  }
  func.func @transform_4(%arg0: i32, %arg1: i32) -> (i32, i32, i32) {
    %c0_i32 = arith.constant 0 : i32
    %c0_i32_0 = arith.constant 0 : i32
    %c0_i32_1 = arith.constant 0 : i32
    %c0_i32_2 = arith.constant 0 : i32
    return %c0_i32, %c0_i32_0, %c0_i32_1 : i32, i32, i32
  }
  func.func @transform_5(%arg0: i32, %arg1: i32) -> (i32, i32, i32) {
    %c0_i32 = arith.constant 0 : i32
    %c0_i32_0 = arith.constant 0 : i32
    %c0_i32_1 = arith.constant 0 : i32
    %c0_i32_2 = arith.constant 0 : i32
    return %c0_i32, %c0_i32_0, %c0_i32_1 : i32, i32, i32
  }
  func.func @transform_6(%arg0: i32, %arg1: i32) -> (i32, i32, i32, i32) {
    %c0_i32 = arith.constant 0 : i32
    %c0_i32_0 = arith.constant 0 : i32
    %c0_i32_1 = arith.constant 0 : i32
    return %arg0, %c0_i32, %c0_i32_0, %arg1 : i32, i32, i32, i32
  }
}

</mosaic_0001>

<bundles_post_ra>
// kernel: _lambda_.1
= control target key start
LH: loop header
LB: loop body
LE: loop exit
PB: predicated region body
PF: predicated region fallthrough
CT: control target
= control target key end

     0   :  { %s592_s21 = smov 0   ;;  %s594_s22 = smov 0   ;;  %s650_s0 = inlined_call_operand.vmem [shape: bf16[2,4,64], index: 0, kind: input, shape index: {}]   ;;  %s651_s1 = inlined_call_operand.vmem [shape: bf16[2,4,64], index: 1, kind: input, shape index: {}]   ;;  %s652_s2 = inlined_call_operand.vmem [shape: bf16[4,4], index: 2, kind: input, shape index: {}]   ;;  %s653_s3 = inlined_call_operand.vmem [shape: bf16[4,4], index: 3, kind: input, shape index: {}]   ;;  %s654_s4 = inlined_call_operand.vmem [shape: f32[2,4,1], index: 4, kind: input, shape index: {}]   ;;  %s655_s5 = inlined_call_operand.vmem [shape: f32[2,4,1], index: 5, kind: input, shape index: {}]   ;;  %s656_s6 = inlined_call_operand.vmem [shape: f32[2,2,4,64], index: 6, kind: output, shape index: {}]  }
   0x1   :  { %s596_s23 = smov 0  }
   0x2 LB: > { %s28_s24 = sadd.s32 1, %s550_s22  ;;  %p492_p0 = scmp.ge.s32.totalorder %s554_s23, 1  ;;  %s554_s23 = sphi %s596_s23, %s16_s23   ;;  %s550_s22 = sphi %s594_s22, %s658_s22   ;;  %s546_s21 = sphi %s592_s21, %s657_s21  }
   0x3   : > { %p30_p1 = scmp.ge.s32.totalorder %s28_s24, 2  ;;  %p244_p2 = scmp.lt.s32.totalorder %s554_s23, 3 }
   0x5   : > { %s660_s24 = smov (%p30_p1, %s28_s24), 0  ;;  %p245_p3 = pnand %p492_p0, %p244_p2 }
   0x6   : > { %p286_p4 = scmp.lt.s32.totalorder (!%p245_p3), %s546_s21, 1 }
   0x7   : > { %248 = sbr.rel (%p245_p3) target bundleno = 161 (0xa1), region = 44 }
   0xc   : > { %v359_v0 = vld [vmem:[%s654_s4] sm:$0xf]  ;;  %v556_v1 = vmov 0   ;;  %s662_s21 = smov (!%p286_p4, %s546_s21), 1  ;;  %v499_v6 = vld [vmem:[%s654_s4 + $0x4] sm:$0xf] }
   0xd   : > { %530 = vset.pattern.permute.xlu0 %v556_v1  ;;  %531 = vset.pattern.permute.xlu1 %v556_v1  ;;  %v366_v2 = vld [vmem:[%s655_s5] sm:$0xf]  ;;  %s493_s29 = sshll.u32 %s662_s21, 1  ;;  %v500_v7 = vld [vmem:[%s655_s5 + $0x4] sm:$0xf]  ;;  %vm322_vm0 = vcmask 1041408  }
   0xe   : > { %362 = vperm.xlu0 %530, %v359_v0   ;;  %369 = vperm.xlu1 %531, %v366_v2   ;;  %s292_s8 = scalar_lea.vmem %s650_s0, %s493_s29  ;;  %s299_s11 = scalar_lea.vmem %s651_s1, %s493_s29  ;;  %v317_v15 = vld [vmem:[%s652_s2] sm:$0x3]  ;;  %vm318_vm1 = vcmask 31744   ;;  %vm373_vm2 = vcmask 519168  }
   0xf   : > { %v309_v3 = vld [vmem:[%s292_s8] sm:$0x3]  ;;  %s504_s20 = sshll.u32 %s662_s21, 3 }
  0x10   : > { %v310_v4 = vunpack.c.l.bf16 %v309_v3  ;;  %v313_v5 = vld [vmem:[%s299_s11] sm:$0x3]  ;;  %s307_s27 = scalar_lea.vmem %s656_s6, %s504_s20 }
  0x11   : > { %v314_v8 = vunpack.c.l.bf16 %v313_v5  ;;  %v339_v16 = vld [vmem:[%s653_s3] sm:$0x3] }
  0x12   : > { %v311_v9 = vmax.f32 %v310_v4, 0.0 }
  0x13   : > { %v315_v10 = vmax.f32 %v314_v8, 0.0 }
  0x14   : > { %v312_v11 = vpack.c.bf16 %v311_v9, %v311_v9 }
  0x15   : > { %v316_v12 = vpack.c.bf16 %v315_v10, %v315_v10 }
  0x16   : > { %379 = vperm.xlu0 %530, %v499_v6   ;;  %387 = vperm.xlu1 %531, %v500_v7   ;;  %v324_v13 = vsel %vm322_vm0, %v312_v11, 0 }
  0x17   : > { %333 = vmatpush.bf16.msra.mxu0 %v324_v13  ;;  %v344_v14 = vsel %vm322_vm0, %v316_v12, 0 }
  0x18   : > { %353 = vmatpush.bf16.msra.mxu1 %v344_v14 }
  0x1a   : > { %497 = vmatmul.msk.bf16.vlgmr.msra.gmra.mxu0 %vm318_vm1, %v317_v15 }
  0x1b   : > { %498 = vmatmul.msk.bf16.vlgmr.msra.gmra.mxu1 %vm318_vm1, %v339_v16 }
  0x80   : > { %v363_v17 = vpop.permute.xlu0 %362  ;;  %v370_v18 = vpop.permute.xlu1 %369 }
  0x88   : > { %v380_v20 = vpop.permute.xlu0 %379  ;;  %v388_v24 = vpop.permute.xlu1 %387 }
  0x97   : > { %v335_v19 = vpop.f32.mrf.mxu0 }
  0x98   : > { %v365_v21 = vmul.f32 %v363_v17, %v335_v19  ;;  %v355_v22 = vpop.f32.mrf.mxu1 }
  0x99   : > { %v382_v23 = vmul.f32 %v380_v20, %v355_v22 }
  0x9a   : > { %v372_v25 = vadd.f32 %v370_v18, %v365_v21 }
  0x9b   : > { %v390_v26 = vadd.f32 %v388_v24, %v382_v23 }
  0x9c   : > { %374 = vst.msk [vmem:[%s307_s27] sm:$0xf] %vm373_vm2, %v372_v25 }
  0x9d   : > { %501 = vst.msk [vmem:[%s307_s27 + $0x4] sm:$0xf] %vm373_vm2, %v390_v26 }
  0x9f   : > { %v337_v27 = vpop.f32.mrf.mxu0 }
  0xa0   : > { %v357_v28 = vpop.f32.mrf.mxu1 }
  0xa1 PF: > { %s16_s23 = sadd.s32 1, %s554_s23   ;;  %s657_s21 = smov %s550_s22 }
  0xa2   : > { %p13_p5 = scmp.ge.s32.totalorder %s16_s23, 4   ;;  %s658_s22 = smov %s660_s24 }
  0xa4   :  { %15 = sbr.rel (!%p13_p5) target bundleno = 2 (0x2), region = 80 }

</bundles_post_ra>
